<compile_context>
chip_gen: v7x
topology: tpu7x:2x2x1
jax: 0.10.0
libtpu: 0.0.40
codegen_flags: <defaults>
</compile_context>

<pallas_src>
import functools
import math

import jax
import jax.numpy as jnp
from jax.experimental import pallas as pl
from jax.experimental.pallas import tpu as pltpu


# ---------------------------------------------------------------------------
# Exact (erf-based) GELU, matching torch.nn.GELU default (approximate='none').
# Abramowitz & Stegun 7.1.26 polynomial (|err| <= 1.5e-7); the divide is
# offloaded to the EUP slot via pl.reciprocal(approx=True).
# ---------------------------------------------------------------------------
def _erf(x):
    a1, a2, a3, a4, a5 = (0.254829592, -0.284496736, 1.421413741,
                          -1.453152027, 1.061405429)
    p = 0.3275911
    ax = jnp.abs(x)
    t = pl.reciprocal(1.0 + p * ax, approx=True)
    poly = ((((a5 * t + a4) * t + a3) * t + a2) * t + a1) * t
    y = 1.0 - poly * jnp.exp(-ax * ax)
    return jnp.where(x >= 0, y, -y)


def _gelu_exact(x):
    return 0.5 * x * (1.0 + _erf(x * (1.0 / math.sqrt(2.0))))


# ---------------------------------------------------------------------------
# Tiled linear kernel: out[i, j] = sum_k x[i, k] @ w[k, j] + b[j]  (+ GELU)
# ---------------------------------------------------------------------------
def _linear_kernel(x_ref, w_ref, b_ref, o_ref, acc_ref, *, apply_gelu):
    k = pl.program_id(2)

    @pl.when(k == 0)
    def _():
        acc_ref[...] = jnp.zeros_like(acc_ref)

    acc_ref[...] += jnp.dot(
        x_ref[...], w_ref[...], preferred_element_type=jnp.float32
    )

    @pl.when(k == pl.num_programs(2) - 1)
    def _():
        r = acc_ref[...] + b_ref[...].astype(jnp.float32)
        if apply_gelu:
            r = _gelu_exact(r)
        o_ref[...] = r.astype(o_ref.dtype)


# ---------------------------------------------------------------------------
# Tile / VMEM helpers
# ---------------------------------------------------------------------------
def _round_up(x, m):
    return ((x + m - 1) // m) * m


def _pick_tile(dim, cap=1024):
    """Largest 128-multiple tile (<= cap) dividing `dim`; small dims stay whole;
    large non-128-multiple dims get 128 (wrapper pads)."""
    if dim <= 256:
        return dim                       # full-dim block (legal BlockSpec)
    if dim % 128 != 0:
        return 128                       # wrapper pads dim up to 128-multiple
    best, t = 128, 128
    while t <= min(dim, cap):
        if dim % t == 0:
            best = t
        t += 128
    return best


def _vmem_limit_bytes():
    """Generation-aware scoped VMEM limit (v5e/v6e: 128 MiB physical, v7x: 64 MiB)."""
    try:
        cap = pltpu.get_tpu_info().vmem_capacity_bytes
    except Exception:
        cap = None
    if not cap:
        cap = 64 * 1024 * 1024           # conservative (v7x per-core VMEM)
    # ~40% headroom for compiler-internal scratch; clamp to [32, 96] MiB.
    return max(32 * 1024 * 1024, min(96 * 1024 * 1024, int(cap * 0.6)))


def _fit_tiles(tm, tn, tk, in_itemsize, out_itemsize, budget):
    """Shrink (only 256-multiple) tiles until the double-buffered working set fits."""
    def ws(tm_, tn_, tk_):
        return (2 * (tm_ * tk_ + tk_ * tn_) * in_itemsize   # x, w (double-buffered)
                + 2 * tn_ * 4                               # bias (f32)
                + tm_ * tn_ * 4                             # f32 accumulator
                + 2 * tm_ * tn_ * out_itemsize)             # output (double-buffered)

    def can_halve(t):
        return t % 256 == 0

    while ws(tm, tn, tk) > budget:
        if can_halve(tk) and tk >= max(tm, tn):
            tk //= 2
        elif can_halve(tm) and tm >= tn:
            tm //= 2
        elif can_halve(tn):
            tn //= 2
        elif can_halve(tk):
            tk //= 2
        elif can_halve(tm):
            tm //= 2
        else:
            break
    return tm, tn, tk


# ---------------------------------------------------------------------------
# Linear (+ fused GELU) via pallas_call
# ---------------------------------------------------------------------------
def pallas_linear(x2d, w, b, *, apply_gelu=False, out_dtype=None):
    M, K = x2d.shape
    Kw, N = w.shape
    assert K == Kw
    if out_dtype is None:
        out_dtype = x2d.dtype

    # bf16 MXU operands, f32 accumulation; bias stays f32 (added in epilogue).
    compute_dtype = jnp.bfloat16
    x2d = x2d.astype(compute_dtype)
    w = w.astype(compute_dtype)
    b = b.astype(jnp.float32)

    tm = _pick_tile(M)
    tn = _pick_tile(N)     # lane-dense output: full dim or a multiple of 128
    tk = _pick_tile(K)     # reduction axis: largest fitting tile, innermost grid axis

    vmem_limit = _vmem_limit_bytes()
    in_isz = jnp.dtype(compute_dtype).itemsize
    out_isz = jnp.dtype(out_dtype).itemsize
    tm, tn, tk = _fit_tiles(tm, tn, tk, in_isz, out_isz, int(vmem_limit * 0.8))

    # Prefer >=2 blocks along the parallel M axis (keeps both v7x TCs busy).
    while tm > 128 and tm % 256 == 0 and pl.cdiv(M, tm) < 2:
        tm //= 2

    # Pad to the tile grid (zero padding is exact for matmul; sliced off below).
    Mp, Np, Kp = _round_up(M, tm), _round_up(N, tn), _round_up(K, tk)
    if Mp != M or Kp != K:
        x2d = jnp.pad(x2d, ((0, Mp - M), (0, Kp - K)))
    if Kp != K or Np != N:
        w = jnp.pad(w, ((0, Kp - K), (0, Np - N)))
    b2d = b.reshape(1, N)
    if Np != N:
        b2d = jnp.pad(b2d, ((0, 0), (0, Np - N)))

    grid = (Mp // tm, Np // tn, Kp // tk)

    out = pl.pallas_call(
        functools.partial(_linear_kernel, apply_gelu=apply_gelu),
        out_shape=jax.ShapeDtypeStruct((Mp, Np), out_dtype),
        grid_spec=pltpu.PrefetchScalarGridSpec(
            num_scalar_prefetch=0,
            grid=grid,
            in_specs=[
                pl.BlockSpec((tm, tk), lambda i, j, k: (i, k)),
                pl.BlockSpec((tk, tn), lambda i, j, k: (k, j)),
                pl.BlockSpec((1, tn), lambda i, j, k: (0, j)),
            ],
            out_specs=pl.BlockSpec((tm, tn), lambda i, j, k: (i, j)),
            scratch_shapes=[pltpu.VMEM((tm, tn), jnp.float32)],
        ),
        compiler_params=pltpu.CompilerParams(
            dimension_semantics=("parallel", "parallel", "arbitrary"),
            vmem_limit_bytes=vmem_limit,
        ),
    )(x2d, w, b2d)

    if Mp != M or Np != N:
        out = out[:M, :N]
    return out


# ---------------------------------------------------------------------------
# FeedForward forward pass
# ---------------------------------------------------------------------------
def feedforward_forward(x, params):
    """x: (B, N, dim) -> (B, N, out_dim). Dropout = identity (eval mode)."""
    B, N, C = x.shape
    x2d = x.reshape(B * N, C)
    # fc1 + exact GELU fused in the kernel epilogue; hidden activation emitted
    # in bf16 to halve the inter-matmul HBM round trip and feed fc2's MXU.
    h = pallas_linear(x2d, params["w1"], params["b1"],
                      apply_gelu=True, out_dtype=jnp.bfloat16)
    # TODO(synk): self.drop after GELU is identity (eval mode).
    o = pallas_linear(h, params["w2"], params["b2"],
                      apply_gelu=False, out_dtype=x.dtype)
    # TODO(synk): self.drop after fc2 is identity (eval mode).
    return o.reshape(B, N, o.shape[-1])


def init_params(key, dim, hidden_dim, out_dim):
    # Shapes match nn.Linear(dim, hidden_dim) / nn.Linear(hidden_dim, out_dim);
    # weights stored already transposed: (in, out).
    k1, k2, k3, k4 = jax.random.split(key, 4)
    s1 = 1.0 / math.sqrt(dim)
    s2 = 1.0 / math.sqrt(hidden_dim)
    return {
        "w1": jax.random.uniform(k1, (dim, hidden_dim), jnp.float32, -s1, s1),
        "b1": jax.random.uniform(k2, (hidden_dim,), jnp.float32, -s1, s1),
        "w2": jax.random.uniform(k3, (hidden_dim, out_dim), jnp.float32, -s2, s2),
        "b2": jax.random.uniform(k4, (out_dim,), jnp.float32, -s2, s2),
    }


def reference_forward(x, params):
    """Pure-JAX f32 reference (exact GELU, as in torch.nn.GELU default)."""
    B, N, C = x.shape
    h = x.reshape(B * N, C) @ params["w1"] + params["b1"]
    h = jax.nn.gelu(h, approximate=False)
    o = h @ params["w2"] + params["b2"]
    return o.reshape(B, N, -1)


if __name__ == "__main__":
    B, N, DIM, HIDDEN = 2, 8, 32, 128   # batch, seq, dim, hidden_dim (out_dim=dim)

    key = jax.random.PRNGKey(0)
    kx, kp = jax.random.split(key)
    x = jax.random.normal(kx, (B, N, DIM), jnp.float32)
    params = init_params(kp, DIM, HIDDEN, DIM)

    out = feedforward_forward(x, params)
    out = jax.block_until_ready(out)

    ref = reference_forward(x, params)
    assert out.shape == (B, N, DIM)
    # bf16 MXU operands + bf16 hidden activation -> relaxed tolerance vs f32 ref.
    err = float(jnp.max(jnp.abs(out.astype(jnp.float32) - ref)))
    assert err < 5e-2, err

    print("KERNEL_OK")
</pallas_src>

<mosaic_0001>
module attributes {stable_mosaic.version = 11 : i64} {
  func.func @_linear_kernel(%arg0: i32, %arg1: i32, %arg2: i32, %arg3: memref<16x32xbf16, #tpu.memory_space<vmem>>, %arg4: memref<32x128xbf16, #tpu.memory_space<vmem>>, %arg5: memref<1x128xf32, #tpu.memory_space<vmem>>, %arg6: memref<16x128xbf16, #tpu.memory_space<vmem>>, %arg7: memref<16x128xf32, #tpu.memory_space<vmem>>) attributes {dimension_semantics = [#tpu.dimension_semantics<parallel>, #tpu.dimension_semantics<parallel>, #tpu.dimension_semantics<arbitrary>], iteration_bounds = array<i64: 1, 1, 1>, scalar_prefetch = 0 : i64, scratch_operands = 1 : i64, tpu.core_type = #tpu.core_type<tc>, window_params = [{transform_indices = @transform_0, window_bounds = array<i64: 16, 32>}, {transform_indices = @transform_1, window_bounds = array<i64: 32, 128>}, {transform_indices = @transform_2, window_bounds = array<i64: 1, 128>}, {transform_indices = @transform_3, window_bounds = array<i64: 16, 128>}]} {
    %c0_i32 = arith.constant 0 : i32
    %0 = arith.cmpi eq, %arg2, %c0_i32 : i32
    %1 = arith.extui %0 : i1 to i32
    %c0_i32_0 = arith.constant 0 : i32
    %2 = arith.cmpi ne, %1, %c0_i32_0 : i32
    scf.if %2 {
      %cst_10 = arith.constant 0.000000e+00 : f32
      %12 = vector.broadcast %cst_10 : f32 to vector<16x128xf32>
      %c0_11 = arith.constant 0 : index
      %c0_12 = arith.constant 0 : index
      %13 = vector.load %arg7[%c0_11, %c0_12] : memref<16x128xf32, #tpu.memory_space<vmem>>, vector<16x128xf32>
      tpu.vector_store %arg7[%c0_11, %c0_12], %12 {strides = array<i32>} : memref<16x128xf32, #tpu.memory_space<vmem>>, vector<16x128xf32>,
    } else {
    }
    %c0 = arith.constant 0 : index
    %c0_1 = arith.constant 0 : index
    %3 = vector.load %arg7[%c0, %c0_1] : memref<16x128xf32, #tpu.memory_space<vmem>>, vector<16x128xf32>
    %c0_2 = arith.constant 0 : index
    %c0_3 = arith.constant 0 : index
    %4 = vector.load %arg3[%c0_2, %c0_3] : memref<16x32xbf16, #tpu.memory_space<vmem>>, vector<16x32xbf16>
    %c0_4 = arith.constant 0 : index
    %c0_5 = arith.constant 0 : index
    %5 = vector.load %arg4[%c0_4, %c0_5] : memref<32x128xbf16, #tpu.memory_space<vmem>>, vector<32x128xbf16>
    %cst = arith.constant dense<0.000000e+00> : vector<16x128xf32>
    %6 = tpu.matmul %4, %5, %cst {dimension_numbers = #tpu.dot_dimension_numbers<[1], [0], [0], [1], [0, 0, 1, 1], [], []>} : vector<16x32xbf16>, vector<32x128xbf16>, vector<16x128xf32> -> vector<16x128xf32>
    %7 = arith.addf %3, %6 : vector<16x128xf32>
    %c0_6 = arith.constant 0 : index
    %c0_7 = arith.constant 0 : index
    %8 = vector.load %arg7[%c0_6, %c0_7] : memref<16x128xf32, #tpu.memory_space<vmem>>, vector<16x128xf32>
    tpu.vector_store %arg7[%c0_6, %c0_7], %7 {strides = array<i32>} : memref<16x128xf32, #tpu.memory_space<vmem>>, vector<16x128xf32>,
    %c0_i32_8 = arith.constant 0 : i32
    %9 = arith.cmpi eq, %arg2, %c0_i32_8 : i32
    %10 = arith.extui %9 : i1 to i32
    %c0_i32_9 = arith.constant 0 : i32
    %11 = arith.cmpi ne, %10, %c0_i32_9 : i32
    scf.if %11 {
      %c0_10 = arith.constant 0 : index
      %c0_11 = arith.constant 0 : index
      %12 = vector.load %arg7[%c0_10, %c0_11] : memref<16x128xf32, #tpu.memory_space<vmem>>, vector<16x128xf32>
      %c0_12 = arith.constant 0 : index
      %c0_13 = arith.constant 0 : index
      %13 = vector.load %arg5[%c0_12, %c0_13] : memref<1x128xf32, #tpu.memory_space<vmem>>, vector<1x128xf32>
      %14 = vector.broadcast %13 : vector<1x128xf32> to vector<16x128xf32>
      %15 = arith.addf %12, %14 : vector<16x128xf32>
      %cst_14 = arith.constant 5.000000e-01 : f32
      %16 = vector.broadcast %cst_14 : f32 to vector<16x128xf32>
      %17 = arith.mulf %16, %15 : vector<16x128xf32>
      %cst_15 = arith.constant 0.707106769 : f32
      %18 = vector.broadcast %cst_15 : f32 to vector<16x128xf32>
      %19 = arith.mulf %15, %18 : vector<16x128xf32>
      %20 = math.absf %19 : vector<16x128xf32>
      %cst_16 = arith.constant 0.327591091 : f32
      %21 = vector.broadcast %cst_16 : f32 to vector<16x128xf32>
      %22 = arith.mulf %21, %20 : vector<16x128xf32>
      %cst_17 = arith.constant 1.000000e+00 : f32
      %23 = vector.broadcast %cst_17 : f32 to vector<16x128xf32>
      %24 = arith.addf %23, %22 : vector<16x128xf32>
      %25 = tpu.reciprocal %24 {approx = true} : vector<16x128xf32> -> vector<16x128xf32>
      %cst_18 = arith.constant 1.06140542 : f32
      %26 = vector.broadcast %cst_18 : f32 to vector<16x128xf32>
      %27 = arith.mulf %26, %25 : vector<16x128xf32>
      %cst_19 = arith.constant -1.45315206 : f32
      %28 = vector.broadcast %cst_19 : f32 to vector<16x128xf32>
      %29 = arith.addf %27, %28 : vector<16x128xf32>
      %30 = arith.mulf %29, %25 : vector<16x128xf32>
      %cst_20 = arith.constant 1.42141378 : f32
      %31 = vector.broadcast %cst_20 : f32 to vector<16x128xf32>
      %32 = arith.addf %30, %31 : vector<16x128xf32>
      %33 = arith.mulf %32, %25 : vector<16x128xf32>
      %cst_21 = arith.constant -0.284496725 : f32
      %34 = vector.broadcast %cst_21 : f32 to vector<16x128xf32>
      %35 = arith.addf %33, %34 : vector<16x128xf32>
      %36 = arith.mulf %35, %25 : vector<16x128xf32>
      %cst_22 = arith.constant 0.254829586 : f32
      %37 = vector.broadcast %cst_22 : f32 to vector<16x128xf32>
      %38 = arith.addf %36, %37 : vector<16x128xf32>
      %39 = arith.mulf %38, %25 : vector<16x128xf32>
      %cst_23 = arith.constant 0.000000e+00 : f32
      %40 = vector.broadcast %cst_23 : f32 to vector<16x128xf32>
      %41 = arith.subf %40, %20 : vector<16x128xf32>
      %42 = arith.mulf %41, %20 : vector<16x128xf32>
      %43 = math.exp %42 : vector<16x128xf32>
      %44 = arith.mulf %39, %43 : vector<16x128xf32>
      %cst_24 = arith.constant 1.000000e+00 : f32
      %45 = vector.broadcast %cst_24 : f32 to vector<16x128xf32>
      %46 = arith.subf %45, %44 : vector<16x128xf32>
      %cst_25 = arith.constant 0.000000e+00 : f32
      %47 = vector.broadcast %cst_25 : f32 to vector<16x128xf32>
      %48 = arith.cmpf oge, %19, %47 : vector<16x128xf32>
      %cst_26 = arith.constant 0.000000e+00 : f32
      %49 = vector.broadcast %cst_26 : f32 to vector<16x128xf32>
      %50 = arith.subf %49, %46 : vector<16x128xf32>
      %51 = arith.select %48, %46, %50 : vector<16x128xi1>, vector<16x128xf32>
      %cst_27 = arith.constant 1.000000e+00 : f32
      %52 = vector.broadcast %cst_27 : f32 to vector<16x128xf32>
      %53 = arith.addf %52, %51 : vector<16x128xf32>
      %54 = arith.mulf %17, %53 : vector<16x128xf32>
      %55 = arith.truncf %54 : vector<16x128xf32> to vector<16x128xbf16>
      %c0_28 = arith.constant 0 : index
      %c0_29 = arith.constant 0 : index
      %56 = vector.load %arg6[%c0_28, %c0_29] : memref<16x128xbf16, #tpu.memory_space<vmem>>, vector<16x128xbf16>
      tpu.vector_store %arg6[%c0_28, %c0_29], %55 {strides = array<i32>} : memref<16x128xbf16, #tpu.memory_space<vmem>>, vector<16x128xbf16>,
    } else {
    }
    return
  }
  func.func @transform_0(%arg0: i32, %arg1: i32, %arg2: i32) -> (i32, i32) {
    %c0_i32 = arith.constant 0 : i32
    return %arg0, %arg2 : i32, i32
  }
  func.func @transform_1(%arg0: i32, %arg1: i32, %arg2: i32) -> (i32, i32) {
    %c0_i32 = arith.constant 0 : i32
    return %arg2, %arg1 : i32, i32
  }
  func.func @transform_2(%arg0: i32, %arg1: i32, %arg2: i32) -> (i32, i32) {
    %c0_i32 = arith.constant 0 : i32
    %c0_i32_0 = arith.constant 0 : i32
    return %c0_i32, %arg1 : i32, i32
  }
  func.func @transform_3(%arg0: i32, %arg1: i32, %arg2: i32) -> (i32, i32) {
    %c0_i32 = arith.constant 0 : i32
    return %arg0, %arg1 : i32, i32
  }
}

</mosaic_0001>

<bundles_post_ra>
// kernel: tpu_custom_call.1
= control target key start
LH: loop header
LB: loop body
LE: loop exit
PB: predicated region body
PF: predicated region fallthrough
CT: control target
= control target key end

     0   :  { %8 = vsyncpa [#allocation4], 0  ;;  %s408_s0 = inlined_call_operand.hbm [shape: bf16[16,32], index: 0, kind: input, shape index: {}]   ;;  %s409_s1 = inlined_call_operand.hbm [shape: bf16[32,128], index: 1, kind: input, shape index: {}]   ;;  %s410_s2 = inlined_call_operand.vmem [shape: f32[1,128], index: 2, kind: input, shape index: {}]   ;;  %s411_s3 = inlined_call_operand.hbm [shape: bf16[16,128], index: 3, kind: output, shape index: {}]  }
   0x1   :  { %9 = vsyncpa [#allocation7], 0 }
   0x2   :  { %10 = vsyncpa [#allocation5], 0  ;;  %s333_s12 = smov [#allocation3]   ;;  %s261_s16 = scalar_lea.hbm %s408_s0, 128 }
   0x3   :  { %s16_s13 = sshll.u32 %s333_s12, 4  ;;  %p262_p0 = scmp.ne.s32.totalorder %s408_s0, %s261_s16  ;;  %s17_s13 = int_to_ptr.vmem [resolvable:$true] %s16_s13 }
   0x4   :  { %p265_p1 = scmp.lt.u32.totalorder %s261_s16, %s408_s0 }
   0x6   :  { %p267_p2 = pnand %p265_p1, %p262_p0 }
   0x8   :  { %270 = shalt.err (!%p267_p2)
}
   0x9   :  { %s271_s21 = scalar_lea.vmem %s17_s13, 128  ;;  %p276_p4 = scmp.lt.s32.totalorder %s17_s13, %s17_s13 }
   0xa   :  { %p272_p3 = scmp.ne.s32.totalorder %s17_s13, %s271_s21  ;;  %p277_p5 = scmp.lt.s32.totalorder %s271_s21, %s271_s21 }
   0xc   :  { %p278_p6 = por %p277_p5, %p276_p4 }
   0xe   :  { %p279_p7 = pnand %p278_p6, %p272_p3 }
  0x10   :  { %282 = shalt.err (!%p279_p7)
}
  0x11   :  { %s334_s22 = smov 64   ;;  %s335_s23 = smov 4  }
  0x12   :  { %22 = dma.hbm_to_vmem [thread:$0]  %s408_s0, 128, %s17_s13, [#allocation4], %s334_s22, %s334_s22, %s335_s23  }
  0x13   :  { %s336_s26 = smov [#allocation6]   ;;  %s283_s30 = scalar_lea.hbm %s409_s1, 256 }
  0x14   :  { %s28_s27 = sshll.u32 %s336_s26, 4  ;;  %p284_p8 = scmp.ne.s32.totalorder %s409_s1, %s283_s30  ;;  %s29_s27 = int_to_ptr.vmem [resolvable:$true] %s28_s27 }
  0x15   :  { %p287_p9 = scmp.lt.u32.totalorder %s283_s30, %s409_s1 }
  0x17   :  { %p289_p10 = pnand %p287_p9, %p284_p8 }
  0x19   :  { %292 = shalt.err (!%p289_p10)
}
  0x1a   :  { %s293_s8 = scalar_lea.vmem %s29_s27, 256  ;;  %p298_p12 = scmp.lt.s32.totalorder %s29_s27, %s29_s27 }
  0x1b   :  { %p294_p11 = scmp.ne.s32.totalorder %s29_s27, %s293_s8  ;;  %p299_p13 = scmp.lt.s32.totalorder %s293_s8, %s293_s8 }
  0x1d   :  { %p300_p0 = por %p299_p13, %p298_p12 }
  0x1f   :  { %p301_p1 = pnand %p300_p0, %p294_p11 }
  0x21   :  { %304 = shalt.err (!%p301_p1)
}
  0x22   :  { %34 = dma.hbm_to_vmem [thread:$0]  %s409_s1, 256, %s29_s27, [#allocation7], %s334_s22, %s334_s22, %s335_s23  }
  0x23   :  { %327 = dma.done.wait [#allocation4], 128  }
  0x24   :  { %328 = vsyncadd [#allocation4], 4294967168 }
  0x25   :  { %329 = dma.done.wait [#allocation7], 256  }
  0x26   :  { %330 = vsyncadd [#allocation7], 4294967040  ;;  %v337_v0 = vmov 0.0   ;;  %vm338_vm0 = vmmov 0   ;;  %v250_v1 = vld [vmem:[#allocation6] sm:$0xff]   ;;  %v251_v2 = vld [vmem:[#allocation6 + $0x8] sm:$0xff]  }
  0x27   :  { %235 = vmatprep.subr.bf16.mxu0 %v337_v0  ;;  %239 = vmatprep.mubr.msk.bf16.mxu0 %vm338_vm0, %v337_v0  ;;  %v252_v3 = vld [vmem:[#allocation3] sm:$0xff]   ;;  %vm75_vm1 = vcmask 261120   ;;  %s339_s1 = smov [#allocation8]  }
  0x28   :  { %236 = vmatpush3.bf16.msra.mxu0 %v250_v1  ;;  %v222_v4 = vld [vmem:[%s410_s2] ss:$0 sm:$0xff]  ;;  %s205_s2 = sshll.u32 %s339_s1, 4  ;;  %s206_s2 = int_to_ptr.vmem [resolvable:$true] %s205_s2 }
  0x29   :  { %237 = vmatprep.subr.bf16.mxu0 %v337_v0  ;;  %s305_s12 = scalar_lea.vmem %s206_s2, 128  ;;  %p310_p3 = scmp.lt.s32.totalorder %s206_s2, %s206_s2 }
  0x2a   :  { %p306_p2 = scmp.ne.s32.totalorder %s206_s2, %s305_s12  ;;  %p311_p4 = scmp.lt.s32.totalorder %s305_s12, %s305_s12 }
  0x2c   :  { %238 = vmatpush3.bf16.msra.mxu0 %v251_v2  ;;  %p312_p5 = por %p311_p4, %p310_p3 }
  0x2e   :  { %p313_p6 = pnand %p312_p5, %p306_p2 }
  0x2f   :  { %240 = vmatmul.mubr.msk.bf16.vlgmr.msra.gmra.mrb[0].mxu0 %vm75_vm1, %v252_v3 }
 0x102   :  { %v113_v5 = vpop.f32.mrb[0].mxu0 }
 0x103   :  { %v136_v6 = vadd.f32 %v222_v4, %v113_v5  ;;  %v241_v7 = vpop.f32.mrb[1].mxu0 }
 0x104   :  { %v116_v8 = vpop.f32.mrb[2].mxu0 }
 0x105   :  { %v140_v9 = vmul.f32 0.70710677, %v136_v6  ;;  %v137_v10 = vadd.f32 %v222_v4, %v116_v8  ;;  %v242_v11 = vpop.f32.mrb[3].mxu0  ;;  %v138_v56 = vmul.f32 0.5, %v136_v6 }
 0x107   :  { %v142_v12 = vand.u32 2147483647, %v140_v9  ;;  %v141_v13 = vmul.f32 0.70710677, %v137_v10  ;;  %vm180_vm2 = vcmp.ge.f32.partialorder %v140_v9, 0.0  ;;  %v139_v57 = vmul.f32 0.5, %v137_v10 }
 0x109   :  { %v144_v14 = vmul.f32 0.3275911, %v142_v12  ;;  %v143_v15 = vand.u32 2147483647, %v141_v13  ;;  %v168_v19 = vsub.f32 0.0, %v142_v12  ;;  %vm181_vm3 = vcmp.ge.f32.partialorder %v141_v13, 0.0 }
 0x10b   :  { %v146_v16 = vadd.f32 1.0, %v144_v14  ;;  %v145_v17 = vmul.f32 0.3275911, %v143_v15  ;;  %v169_v20 = vsub.f32 0.0, %v143_v15  ;;  %v170_v22 = vmul.f32 %v168_v19, %v142_v12 }
 0x10d   :  { %253 = vrcp.f32 %v146_v16  ;;  %v147_v18 = vadd.f32 1.0, %v145_v17  ;;  %v171_v26 = vmul.f32 %v169_v20, %v143_v15  ;;  %v172_v27 = vmul.f32 1.442695, %v170_v22 }
 0x10f   :  { %255 = vrcp.f32 %v147_v18  ;;  %v174_v32 = vmul.f32 1.442695, %v171_v26 }
 0x110   :  { %257 = vpow2.f32 %v172_v27 }
 0x111   :  { %259 = vpow2.f32 %v174_v32 }
 0x117   :  { %v254_v21 = vpop.eup %253 }
 0x118   :  { %v150_v23 = vmul.f32 1.0614054, %v254_v21 }
 0x119   :  { %v256_v24 = vpop.eup %255 }
 0x11a   :  { %v152_v25 = vadd.f32 -1.4531521, %v150_v23  ;;  %v151_v28 = vmul.f32 1.0614054, %v256_v24  ;;  %v258_v43 = vpop.eup %257 }
 0x11b   :  { %v260_v47 = vpop.eup %259 }
 0x11c   :  { %v154_v29 = vmul.f32 %v254_v21, %v152_v25  ;;  %v153_v30 = vadd.f32 -1.4531521, %v151_v28 }
 0x11e   :  { %v156_v31 = vadd.f32 1.4214138, %v154_v29  ;;  %v155_v33 = vmul.f32 %v256_v24, %v153_v30 }
 0x120   :  { %v158_v34 = vmul.f32 %v254_v21, %v156_v31  ;;  %v157_v35 = vadd.f32 1.4214138, %v155_v33 }
 0x122   :  { %v160_v36 = vadd.f32 -0.28449672, %v158_v34  ;;  %v159_v37 = vmul.f32 %v256_v24, %v157_v35 }
 0x124   :  { %v162_v38 = vmul.f32 %v254_v21, %v160_v36  ;;  %v161_v39 = vadd.f32 -0.28449672, %v159_v37 }
 0x126   :  { %v164_v40 = vadd.f32 0.2548296, %v162_v38  ;;  %v163_v41 = vmul.f32 %v256_v24, %v161_v39 }
 0x128   :  { %v166_v42 = vmul.f32 %v254_v21, %v164_v40  ;;  %v165_v44 = vadd.f32 0.2548296, %v163_v41 }
 0x12a   :  { %v176_v45 = vmul.f32 %v258_v43, %v166_v42  ;;  %v167_v46 = vmul.f32 %v256_v24, %v165_v44 }
 0x12c   :  { %v178_v48 = vsub.f32 1.0, %v176_v45  ;;  %v177_v49 = vmul.f32 %v260_v47, %v167_v46 }
 0x12e   :  { %v182_v50 = vsub.f32 0.0, %v178_v48  ;;  %v179_v51 = vsub.f32 1.0, %v177_v49 }
 0x130   :  { %v184_v52 = vsel %vm180_vm2, %v178_v48, %v182_v50  ;;  %v183_v53 = vsub.f32 0.0, %v179_v51 }
 0x131   :  { %v186_v54 = vadd.f32 1.0, %v184_v52 }
 0x132   :  { %v185_v55 = vsel %vm181_vm3, %v179_v51, %v183_v53 }
 0x133   :  { %v187_v58 = vadd.f32 1.0, %v185_v55  ;;  %v188_v59 = vmul.f32 %v186_v54, %v138_v56 }
 0x135   :  { %v189_v60 = vmul.f32 %v187_v58, %v139_v57 }
 0x137   :  { %v230_v61 = vpack.c.bf16 %v189_v60, %v188_v59 }
 0x139   :  { %231 = vst [vmem:[#allocation8] sm:$0xff] %v230_v61  }
 0x13a   :  { %316 = shalt.err (!%p313_p6)
}
 0x13b   :  { %s317_s15 = scalar_lea.hbm %s411_s3, 128 }
 0x13c   :  { %p318_p7 = scmp.ne.s32.totalorder %s411_s3, %s317_s15  ;;  %p321_p8 = scmp.lt.u32.totalorder %s317_s15, %s411_s3 }
 0x13e   :  { %p323_p9 = pnand %p321_p8, %p318_p7 }
 0x140   :  { %326 = shalt.err (!%p323_p9)
}
 0x141   :  { %211 = dma.vmem_to_hbm [thread:$0]  %s206_s2, 128, %s411_s3, [#allocation5], %s334_s22, %s334_s22, %s335_s23  }
 0x142   :  { %331 = dma.done.wait [#allocation5], 128  }
 0x143   :  { %332 = vsyncadd [#allocation5], 4294967168 }
 0x144   :  { %215 = vsyncpa [#allocation4], 1 }
 0x145   :  { %216 = vsyncpa [#allocation7], 1 }
 0x146   :  { %217 = vsyncpa [#allocation5], 1 }

</bundles_post_ra>
